<compile_context>
chip_gen: v7x
topology: tpu7x:2x2x1
jax: 0.10.0
libtpu: 0.0.40
codegen_flags: <defaults>
</compile_context>

<pallas_src>
import functools

import numpy as np
import jax
import jax.numpy as jnp
from jax.experimental import pallas as pl
from jax.experimental.pallas import tpu as pltpu  # noqa: F401  (kept for easy tuning)

# ---------------- configuration (small, consistent with the module) ----------------
BATCH = 2
NUM_NODES = 8
NUM_FEATURES = 4
NUM_HIDDENS = 32          # d_model
K_HOPS = 2                # SGConv K
N_HEADS = 5
D_K = 20
D_V = 20
D_FF = 4 * NUM_HIDDENS


# ======================= glue: SGConv edge normalization =======================
def build_prop_matrix(edge_index_np, edge_weight, num_nodes_total):
    """Replicates NewSGConv.norm + PyG propagate as a dense (BN, BN) matrix.

    out[i] = sum_{e: col[e]==i} norm[e] * x[row[e]]  ->  out = A_prop @ x
    """
    row = edge_index_np[0].astype(np.int64)
    col = edge_index_np[1].astype(np.int64)
    mask = row != col
    nonself = np.nonzero(mask)[0]
    selfe = np.nonzero(~mask)[0]

    # add_remaining_self_loops(fill_value=1)
    loop_weight = jnp.ones((num_nodes_total,), dtype=edge_weight.dtype)
    if selfe.size > 0:
        loop_weight = loop_weight.at[row[selfe]].set(edge_weight[selfe])
    row_new = np.concatenate([row[nonself], np.arange(num_nodes_total)])
    col_new = np.concatenate([col[nonself], np.arange(num_nodes_total)])
    w_new = jnp.concatenate([edge_weight[nonself], loop_weight])

    # deg = scatter_add(|w|, row); norm = D^-1/2 w D^-1/2   (matches NewSGConv.norm)
    deg = jnp.zeros((num_nodes_total,), edge_weight.dtype).at[row_new].add(jnp.abs(w_new))
    dinv = deg ** -0.5
    dinv = jnp.where(jnp.isinf(dinv), 0.0, dinv)
    norm = dinv[row_new] * w_new * dinv[col_new]

    a = jnp.zeros((num_nodes_total, num_nodes_total), edge_weight.dtype)
    a = a.at[col_new, row_new].add(norm)
    return a


# ======================= fused kernel: SGCN + encoder layer =======================
def _layer_norm(x, gamma, beta, eps=1e-5):
    mu = jnp.mean(x, axis=-1, keepdims=True)
    var = jnp.mean((x - mu) ** 2, axis=-1, keepdims=True)
    return (x - mu) * jax.lax.rsqrt(var + eps) * gamma + beta


def _fused_kernel(a_ref, x_ref, wlin_ref, blin_ref,
                  wqkv_ref, bqkv_ref, wo_ref, bo_ref,
                  g1_ref, be1_ref, w1_ref, b1_ref, w2_ref, b2_ref,
                  g2_ref, be2_ref, o_ref, *, n_heads, d_k, d_v):
    f32 = jnp.float32

    # ---- SGCN: linear first (associativity: (A^K x)W = A^K(xW)), one hop of A^K ----
    h = jnp.dot(x_ref[...], wlin_ref[...], preferred_element_type=f32)      # (S, D)
    h = jnp.dot(a_ref[...], h, preferred_element_type=f32)                  # (S, D)
    x = h + blin_ref[...]                                                   # (S, D)

    # ---- multi-head self-attention: one fused QKV matmul, one output projection ----
    qkv = jnp.dot(x, wqkv_ref[...], preferred_element_type=f32) + bqkv_ref[...]  # (S, 3*H*dk)
    q_span = n_heads * d_k
    k_span = n_heads * d_k
    q_all = qkv[:, :q_span]
    k_all = qkv[:, q_span:q_span + k_span]
    v_all = qkv[:, q_span + k_span:]

    ctxs = []
    for hd in range(n_heads):
        qh = q_all[:, hd * d_k:(hd + 1) * d_k]                              # (S, dk), pre-scaled
        kh = k_all[:, hd * d_k:(hd + 1) * d_k]                              # (S, dk)
        vh = v_all[:, hd * d_v:(hd + 1) * d_v]                              # (S, dv)
        # qh @ kh.T without materializing a transpose.
        scores = jax.lax.dot_general(qh, kh, (((1,), (1,)), ((), ())),
                                     preferred_element_type=f32)            # (S, S)
        scores = scores - jnp.max(scores, axis=-1, keepdims=True)
        e = jnp.exp(scores)
        ctx = jnp.dot(e, vh, preferred_element_type=f32)                    # (S, dv)
        # exact per-row softmax normalization applied to the small context
        inv = pl.reciprocal(jnp.sum(e, axis=-1, keepdims=True), approx=False)
        ctxs.append(ctx * inv)
    ctx = jnp.concatenate(ctxs, axis=-1)                                    # (S, H*dv)
    attn_out = jnp.dot(ctx, wo_ref[...], preferred_element_type=f32) + bo_ref[...]

    # ---- residual + LayerNorm, position-wise FFN, residual + LayerNorm ----
    h1 = _layer_norm(attn_out + x, g1_ref[...], be1_ref[...])
    ff = jnp.maximum(
        jnp.dot(h1, w1_ref[...], preferred_element_type=f32) + b1_ref[...], 0.0)
    ff = jnp.dot(ff, w2_ref[...], preferred_element_type=f32) + b2_ref[...]
    o_ref[...] = _layer_norm(ff + h1, g2_ref[...], be2_ref[...])


# ======================= full forward =======================
def sgcn_transformer_forward(x, edge_index_np, edge_weight, params, batch_size):
    n, d = NUM_NODES, NUM_HIDDENS
    n_total = batch_size * n

    # edge_weight.reshape(-1).repeat(batch_size)  (torch 1-D repeat == tile)
    ew_gcn = jnp.tile(edge_weight.reshape(-1), batch_size)
    a = build_prop_matrix(edge_index_np, ew_gcn, n_total)                   # (BN, BN)
    # Precompute A^K in the wrapper (pure latency removal inside the kernel).
    a_k = a
    for _ in range(K_HOPS - 1):
        a_k = jnp.dot(a_k, a, precision=jax.lax.Precision.HIGHEST)

    # Fused [Wq|Wk|Wv] with 1/sqrt(d_k) folded into Wq and bq (wrapper-side, free).
    scale = 1.0 / (D_K ** 0.5)
    w_qkv = jnp.concatenate([params["wq"] * scale, params["wk"], params["wv"]], axis=1)
    b_qkv = jnp.concatenate([params["bq"] * scale, params["bk"], params["bv"]], axis=1)

    operands = [a_k, x, params["w_lin"], params["b_lin"],
                w_qkv, b_qkv, params["wo"], params["bo"],
                params["ln1_g"], params["ln1_b"],
                params["w1"], params["b1"], params["w2"], params["b2"],
                params["ln2_g"], params["ln2_b"]]

    # Single invocation, whole arrays resident in VMEM (total footprint << 1 MiB).
    return pl.pallas_call(
        functools.partial(_fused_kernel, n_heads=N_HEADS, d_k=D_K, d_v=D_V),
        out_shape=jax.ShapeDtypeStruct((n_total, d), jnp.float32),
    )(*operands)


# ======================= deterministic parameters & inputs =======================
def init_params(key):
    ks = jax.random.split(key, 12)
    rnd = lambda k, shape: (0.1 * jax.random.normal(k, shape)).astype(jnp.float32)
    return {
        # SGConv linear: Linear(num_features, num_hiddens) stored as (in, out)
        "w_lin": rnd(ks[0], (NUM_FEATURES, NUM_HIDDENS)),
        "b_lin": rnd(ks[1], (1, NUM_HIDDENS)),
        # Multi-head attention (flat layouts; fused/scaled in the wrapper)
        "wq": rnd(ks[2], (NUM_HIDDENS, N_HEADS * D_K)),
        "bq": rnd(ks[3], (1, N_HEADS * D_K)),
        "wk": rnd(ks[4], (NUM_HIDDENS, N_HEADS * D_K)),
        "bk": rnd(ks[5], (1, N_HEADS * D_K)),
        "wv": rnd(ks[6], (NUM_HIDDENS, N_HEADS * D_V)),
        "bv": rnd(ks[7], (1, N_HEADS * D_V)),
        "wo": rnd(ks[8], (N_HEADS * D_V, NUM_HIDDENS)),
        "bo": rnd(ks[9], (1, NUM_HIDDENS)),
        "ln1_g": jnp.ones((1, NUM_HIDDENS), jnp.float32),
        "ln1_b": jnp.zeros((1, NUM_HIDDENS), jnp.float32),
        # Position-wise FFN
        "w1": rnd(ks[10], (NUM_HIDDENS, D_FF)),
        "b1": jnp.zeros((1, D_FF), jnp.float32),
        "w2": rnd(ks[11], (D_FF, NUM_HIDDENS)),
        "b2": jnp.zeros((1, NUM_HIDDENS), jnp.float32),
        "ln2_g": jnp.ones((1, NUM_HIDDENS), jnp.float32),
        "ln2_b": jnp.zeros((1, NUM_HIDDENS), jnp.float32),
    }


def build_edge_index(batch_size, num_nodes):
    # fully-connected graph (incl. self loops) per batch element, block-diagonal
    rows, cols = np.meshgrid(np.arange(num_nodes), np.arange(num_nodes), indexing="ij")
    base = np.stack([rows.reshape(-1), cols.reshape(-1)], axis=0)     # (2, n*n)
    return np.concatenate([base + b * num_nodes for b in range(batch_size)], axis=1)


if __name__ == "__main__":
    root = jax.random.PRNGKey(0)
    k_x, k_ew, k_p = jax.random.split(root, 3)

    x = jax.random.normal(k_x, (BATCH * NUM_NODES, NUM_FEATURES), jnp.float32)
    edge_weight = jax.random.normal(k_ew, (NUM_NODES, NUM_NODES), jnp.float32)
    edge_index = build_edge_index(BATCH, NUM_NODES)                   # (2, B*n*n), static
    params = init_params(k_p)

    out = sgcn_transformer_forward(x, edge_index, edge_weight, params, BATCH)
    out = jax.block_until_ready(out)
    assert out.shape == (BATCH * NUM_NODES, NUM_HIDDENS)
    assert bool(jnp.all(jnp.isfinite(out)))
    print("KERNEL_OK")
</pallas_src>

<mosaic_0001>
module attributes {stable_mosaic.version = 11 : i64} {
  func.func @_fused_kernel(%arg0: memref<16x16xf32, #tpu.memory_space<vmem>>, %arg1: memref<16x4xf32, #tpu.memory_space<vmem>>, %arg2: memref<4x32xf32, #tpu.memory_space<vmem>>, %arg3: memref<1x32xf32, #tpu.memory_space<vmem>>, %arg4: memref<32x300xf32, #tpu.memory_space<vmem>>, %arg5: memref<1x300xf32, #tpu.memory_space<vmem>>, %arg6: memref<100x32xf32, #tpu.memory_space<vmem>>, %arg7: memref<1x32xf32, #tpu.memory_space<vmem>>, %arg8: memref<1x32xf32, #tpu.memory_space<vmem>>, %arg9: memref<1x32xf32, #tpu.memory_space<vmem>>, %arg10: memref<32x128xf32, #tpu.memory_space<vmem>>, %arg11: memref<1x128xf32, #tpu.memory_space<vmem>>, %arg12: memref<128x32xf32, #tpu.memory_space<vmem>>, %arg13: memref<1x32xf32, #tpu.memory_space<vmem>>, %arg14: memref<1x32xf32, #tpu.memory_space<vmem>>, %arg15: memref<1x32xf32, #tpu.memory_space<vmem>>, %arg16: memref<16x32xf32, #tpu.memory_space<vmem>>) attributes {dimension_semantics = [], scalar_prefetch = 0 : i64, scratch_operands = 0 : i64, tpu.core_type = #tpu.core_type<tc>} {
    %c0 = arith.constant 0 : index
    %c0_0 = arith.constant 0 : index
    %0 = vector.load %arg1[%c0, %c0_0] : memref<16x4xf32, #tpu.memory_space<vmem>>, vector<16x4xf32>
    %c0_1 = arith.constant 0 : index
    %c0_2 = arith.constant 0 : index
    %1 = vector.load %arg2[%c0_1, %c0_2] : memref<4x32xf32, #tpu.memory_space<vmem>>, vector<4x32xf32>
    %cst = arith.constant dense<0.000000e+00> : vector<16x32xf32>
    %2 = tpu.matmul %0, %1, %cst {dimension_numbers = #tpu.dot_dimension_numbers<[1], [0], [0], [1], [0, 0, 1, 1], [], []>} : vector<16x4xf32>, vector<4x32xf32>, vector<16x32xf32> -> vector<16x32xf32>
    %c0_3 = arith.constant 0 : index
    %c0_4 = arith.constant 0 : index
    %3 = vector.load %arg0[%c0_3, %c0_4] : memref<16x16xf32, #tpu.memory_space<vmem>>, vector<16x16xf32>
    %cst_5 = arith.constant dense<0.000000e+00> : vector<16x32xf32>
    %4 = tpu.matmul %3, %2, %cst_5 {dimension_numbers = #tpu.dot_dimension_numbers<[1], [0], [0], [1], [0, 0, 1, 1], [], []>} : vector<16x16xf32>, vector<16x32xf32>, vector<16x32xf32> -> vector<16x32xf32>
    %c0_6 = arith.constant 0 : index
    %c0_7 = arith.constant 0 : index
    %5 = vector.load %arg3[%c0_6, %c0_7] : memref<1x32xf32, #tpu.memory_space<vmem>>, vector<1x32xf32>
    %6 = vector.broadcast %5 : vector<1x32xf32> to vector<16x32xf32>
    %7 = arith.addf %4, %6 : vector<16x32xf32>
    %c0_8 = arith.constant 0 : index
    %c0_9 = arith.constant 0 : index
    %8 = vector.load %arg4[%c0_8, %c0_9] : memref<32x300xf32, #tpu.memory_space<vmem>>, vector<32x300xf32>
    %cst_10 = arith.constant dense<0.000000e+00> : vector<16x300xf32>
    %9 = tpu.matmul %7, %8, %cst_10 {dimension_numbers = #tpu.dot_dimension_numbers<[1], [0], [0], [1], [0, 0, 1, 1], [], []>} : vector<16x32xf32>, vector<32x300xf32>, vector<16x300xf32> -> vector<16x300xf32>
    %c0_11 = arith.constant 0 : index
    %c0_12 = arith.constant 0 : index
    %10 = vector.load %arg5[%c0_11, %c0_12] : memref<1x300xf32, #tpu.memory_space<vmem>>, vector<1x300xf32>
    %11 = vector.broadcast %10 : vector<1x300xf32> to vector<16x300xf32>
    %12 = arith.addf %9, %11 : vector<16x300xf32>
    %13 = vector.extract_strided_slice %12 {offsets = [0, 0], sizes = [16, 100], strides = [1, 1]} : vector<16x300xf32> to vector<16x100xf32>
    %14 = vector.extract_strided_slice %12 {offsets = [0, 100], sizes = [16, 100], strides = [1, 1]} : vector<16x300xf32> to vector<16x100xf32>
    %15 = vector.extract_strided_slice %12 {offsets = [0, 200], sizes = [16, 100], strides = [1, 1]} : vector<16x300xf32> to vector<16x100xf32>
    %16 = vector.extract_strided_slice %13 {offsets = [0, 0], sizes = [16, 20], strides = [1, 1]} : vector<16x100xf32> to vector<16x20xf32>
    %17 = vector.extract_strided_slice %14 {offsets = [0, 0], sizes = [16, 20], strides = [1, 1]} : vector<16x100xf32> to vector<16x20xf32>
    %18 = vector.extract_strided_slice %15 {offsets = [0, 0], sizes = [16, 20], strides = [1, 1]} : vector<16x100xf32> to vector<16x20xf32>
    %cst_13 = arith.constant dense<0.000000e+00> : vector<16x16xf32>
    %19 = tpu.matmul %16, %17, %cst_13 {dimension_numbers = #tpu.dot_dimension_numbers<[1], [1], [0], [0], [0, 0, 1, 0], [], []>} : vector<16x20xf32>, vector<16x20xf32>, vector<16x16xf32> -> vector<16x16xf32>
    %cst_14 = arith.constant dense<0xFF800000> : vector<16xf32>
    %20 = vector.multi_reduction <maximumf>, %19, %cst_14 [1] : vector<16x16xf32> to vector<16xf32>
    %21 = vector.shape_cast %20 : vector<16xf32> to vector<16x1xf32>
    %22 = vector.broadcast %21 : vector<16x1xf32> to vector<16x16xf32>
    %23 = arith.subf %19, %22 : vector<16x16xf32>
    %24 = math.exp %23 : vector<16x16xf32>
    %cst_15 = arith.constant dense<0.000000e+00> : vector<16x20xf32>
    %25 = tpu.matmul %24, %18, %cst_15 {dimension_numbers = #tpu.dot_dimension_numbers<[1], [0], [0], [1], [0, 0, 1, 1], [], []>} : vector<16x16xf32>, vector<16x20xf32>, vector<16x20xf32> -> vector<16x20xf32>
    %cst_16 = arith.constant dense<0.000000e+00> : vector<16xf32>
    %26 = vector.multi_reduction <add>, %24, %cst_16 [1] : vector<16x16xf32> to vector<16xf32>
    %27 = vector.shape_cast %26 : vector<16xf32> to vector<16x1xf32>
    %28 = tpu.reciprocal %27 : vector<16x1xf32> -> vector<16x1xf32>
    %29 = vector.broadcast %28 : vector<16x1xf32> to vector<16x20xf32>
    %30 = arith.mulf %25, %29 : vector<16x20xf32>
    %31 = vector.extract_strided_slice %13 {offsets = [0, 20], sizes = [16, 20], strides = [1, 1]} : vector<16x100xf32> to vector<16x20xf32>
    %32 = vector.extract_strided_slice %14 {offsets = [0, 20], sizes = [16, 20], strides = [1, 1]} : vector<16x100xf32> to vector<16x20xf32>
    %33 = vector.extract_strided_slice %15 {offsets = [0, 20], sizes = [16, 20], strides = [1, 1]} : vector<16x100xf32> to vector<16x20xf32>
    %cst_17 = arith.constant dense<0.000000e+00> : vector<16x16xf32>
    %34 = tpu.matmul %31, %32, %cst_17 {dimension_numbers = #tpu.dot_dimension_numbers<[1], [1], [0], [0], [0, 0, 1, 0], [], []>} : vector<16x20xf32>, vector<16x20xf32>, vector<16x16xf32> -> vector<16x16xf32>
    %cst_18 = arith.constant dense<0xFF800000> : vector<16xf32>
    %35 = vector.multi_reduction <maximumf>, %34, %cst_18 [1] : vector<16x16xf32> to vector<16xf32>
    %36 = vector.shape_cast %35 : vector<16xf32> to vector<16x1xf32>
    %37 = vector.broadcast %36 : vector<16x1xf32> to vector<16x16xf32>
    %38 = arith.subf %34, %37 : vector<16x16xf32>
    %39 = math.exp %38 : vector<16x16xf32>
    %cst_19 = arith.constant dense<0.000000e+00> : vector<16x20xf32>
    %40 = tpu.matmul %39, %33, %cst_19 {dimension_numbers = #tpu.dot_dimension_numbers<[1], [0], [0], [1], [0, 0, 1, 1], [], []>} : vector<16x16xf32>, vector<16x20xf32>, vector<16x20xf32> -> vector<16x20xf32>
    %cst_20 = arith.constant dense<0.000000e+00> : vector<16xf32>
    %41 = vector.multi_reduction <add>, %39, %cst_20 [1] : vector<16x16xf32> to vector<16xf32>
    %42 = vector.shape_cast %41 : vector<16xf32> to vector<16x1xf32>
    %43 = tpu.reciprocal %42 : vector<16x1xf32> -> vector<16x1xf32>
    %44 = vector.broadcast %43 : vector<16x1xf32> to vector<16x20xf32>
    %45 = arith.mulf %40, %44 : vector<16x20xf32>
    %46 = vector.extract_strided_slice %13 {offsets = [0, 40], sizes = [16, 20], strides = [1, 1]} : vector<16x100xf32> to vector<16x20xf32>
    %47 = vector.extract_strided_slice %14 {offsets = [0, 40], sizes = [16, 20], strides = [1, 1]} : vector<16x100xf32> to vector<16x20xf32>
    %48 = vector.extract_strided_slice %15 {offsets = [0, 40], sizes = [16, 20], strides = [1, 1]} : vector<16x100xf32> to vector<16x20xf32>
    %cst_21 = arith.constant dense<0.000000e+00> : vector<16x16xf32>
    %49 = tpu.matmul %46, %47, %cst_21 {dimension_numbers = #tpu.dot_dimension_numbers<[1], [1], [0], [0], [0, 0, 1, 0], [], []>} : vector<16x20xf32>, vector<16x20xf32>, vector<16x16xf32> -> vector<16x16xf32>
    %cst_22 = arith.constant dense<0xFF800000> : vector<16xf32>
    %50 = vector.multi_reduction <maximumf>, %49, %cst_22 [1] : vector<16x16xf32> to vector<16xf32>
    %51 = vector.shape_cast %50 : vector<16xf32> to vector<16x1xf32>
    %52 = vector.broadcast %51 : vector<16x1xf32> to vector<16x16xf32>
    %53 = arith.subf %49, %52 : vector<16x16xf32>
    %54 = math.exp %53 : vector<16x16xf32>
    %cst_23 = arith.constant dense<0.000000e+00> : vector<16x20xf32>
    %55 = tpu.matmul %54, %48, %cst_23 {dimension_numbers = #tpu.dot_dimension_numbers<[1], [0], [0], [1], [0, 0, 1, 1], [], []>} : vector<16x16xf32>, vector<16x20xf32>, vector<16x20xf32> -> vector<16x20xf32>
    %cst_24 = arith.constant dense<0.000000e+00> : vector<16xf32>
    %56 = vector.multi_reduction <add>, %54, %cst_24 [1] : vector<16x16xf32> to vector<16xf32>
    %57 = vector.shape_cast %56 : vector<16xf32> to vector<16x1xf32>
    %58 = tpu.reciprocal %57 : vector<16x1xf32> -> vector<16x1xf32>
    %59 = vector.broadcast %58 : vector<16x1xf32> to vector<16x20xf32>
    %60 = arith.mulf %55, %59 : vector<16x20xf32>
    %61 = vector.extract_strided_slice %13 {offsets = [0, 60], sizes = [16, 20], strides = [1, 1]} : vector<16x100xf32> to vector<16x20xf32>
    %62 = vector.extract_strided_slice %14 {offsets = [0, 60], sizes = [16, 20], strides = [1, 1]} : vector<16x100xf32> to vector<16x20xf32>
    %63 = vector.extract_strided_slice %15 {offsets = [0, 60], sizes = [16, 20], strides = [1, 1]} : vector<16x100xf32> to vector<16x20xf32>
    %cst_25 = arith.constant dense<0.000000e+00> : vector<16x16xf32>
    %64 = tpu.matmul %61, %62, %cst_25 {dimension_numbers = #tpu.dot_dimension_numbers<[1], [1], [0], [0], [0, 0, 1, 0], [], []>} : vector<16x20xf32>, vector<16x20xf32>, vector<16x16xf32> -> vector<16x16xf32>
    %cst_26 = arith.constant dense<0xFF800000> : vector<16xf32>
    %65 = vector.multi_reduction <maximumf>, %64, %cst_26 [1] : vector<16x16xf32> to vector<16xf32>
    %66 = vector.shape_cast %65 : vector<16xf32> to vector<16x1xf32>
    %67 = vector.broadcast %66 : vector<16x1xf32> to vector<16x16xf32>
    %68 = arith.subf %64, %67 : vector<16x16xf32>
    %69 = math.exp %68 : vector<16x16xf32>
    %cst_27 = arith.constant dense<0.000000e+00> : vector<16x20xf32>
    %70 = tpu.matmul %69, %63, %cst_27 {dimension_numbers = #tpu.dot_dimension_numbers<[1], [0], [0], [1], [0, 0, 1, 1], [], []>} : vector<16x16xf32>, vector<16x20xf32>, vector<16x20xf32> -> vector<16x20xf32>
    %cst_28 = arith.constant dense<0.000000e+00> : vector<16xf32>
    %71 = vector.multi_reduction <add>, %69, %cst_28 [1] : vector<16x16xf32> to vector<16xf32>
    %72 = vector.shape_cast %71 : vector<16xf32> to vector<16x1xf32>
    %73 = tpu.reciprocal %72 : vector<16x1xf32> -> vector<16x1xf32>
    %74 = vector.broadcast %73 : vector<16x1xf32> to vector<16x20xf32>
    %75 = arith.mulf %70, %74 : vector<16x20xf32>
    %76 = vector.extract_strided_slice %13 {offsets = [0, 80], sizes = [16, 20], strides = [1, 1]} : vector<16x100xf32> to vector<16x20xf32>
    %77 = vector.extract_strided_slice %14 {offsets = [0, 80], sizes = [16, 20], strides = [1, 1]} : vector<16x100xf32> to vector<16x20xf32>
    %78 = vector.extract_strided_slice %15 {offsets = [0, 80], sizes = [16, 20], strides = [1, 1]} : vector<16x100xf32> to vector<16x20xf32>
    %cst_29 = arith.constant dense<0.000000e+00> : vector<16x16xf32>
    %79 = tpu.matmul %76, %77, %cst_29 {dimension_numbers = #tpu.dot_dimension_numbers<[1], [1], [0], [0], [0, 0, 1, 0], [], []>} : vector<16x20xf32>, vector<16x20xf32>, vector<16x16xf32> -> vector<16x16xf32>
    %cst_30 = arith.constant dense<0xFF800000> : vector<16xf32>
    %80 = vector.multi_reduction <maximumf>, %79, %cst_30 [1] : vector<16x16xf32> to vector<16xf32>
    %81 = vector.shape_cast %80 : vector<16xf32> to vector<16x1xf32>
    %82 = vector.broadcast %81 : vector<16x1xf32> to vector<16x16xf32>
    %83 = arith.subf %79, %82 : vector<16x16xf32>
    %84 = math.exp %83 : vector<16x16xf32>
    %cst_31 = arith.constant dense<0.000000e+00> : vector<16x20xf32>
    %85 = tpu.matmul %84, %78, %cst_31 {dimension_numbers = #tpu.dot_dimension_numbers<[1], [0], [0], [1], [0, 0, 1, 1], [], []>} : vector<16x16xf32>, vector<16x20xf32>, vector<16x20xf32> -> vector<16x20xf32>
    %cst_32 = arith.constant dense<0.000000e+00> : vector<16xf32>
    %86 = vector.multi_reduction <add>, %84, %cst_32 [1] : vector<16x16xf32> to vector<16xf32>
    %87 = vector.shape_cast %86 : vector<16xf32> to vector<16x1xf32>
    %88 = tpu.reciprocal %87 : vector<16x1xf32> -> vector<16x1xf32>
    %89 = vector.broadcast %88 : vector<16x1xf32> to vector<16x20xf32>
    %90 = arith.mulf %85, %89 : vector<16x20xf32>
    %91 = tpu.concatenate %30, %45, %60, %75, %90 in 1 : vector<16x20xf32>, vector<16x20xf32>, vector<16x20xf32>, vector<16x20xf32>, vector<16x20xf32> -> vector<16x100xf32>
    %c0_33 = arith.constant 0 : index
    %c0_34 = arith.constant 0 : index
    %92 = vector.load %arg6[%c0_33, %c0_34] : memref<100x32xf32, #tpu.memory_space<vmem>>, vector<100x32xf32>
    %cst_35 = arith.constant dense<0.000000e+00> : vector<16x32xf32>
    %93 = tpu.matmul %91, %92, %cst_35 {dimension_numbers = #tpu.dot_dimension_numbers<[1], [0], [0], [1], [0, 0, 1, 1], [], []>} : vector<16x100xf32>, vector<100x32xf32>, vector<16x32xf32> -> vector<16x32xf32>
    %c0_36 = arith.constant 0 : index
    %c0_37 = arith.constant 0 : index
    %94 = vector.load %arg7[%c0_36, %c0_37] : memref<1x32xf32, #tpu.memory_space<vmem>>, vector<1x32xf32>
    %95 = vector.broadcast %94 : vector<1x32xf32> to vector<16x32xf32>
    %96 = arith.addf %93, %95 : vector<16x32xf32>
    %97 = arith.addf %96, %7 : vector<16x32xf32>
    %c0_38 = arith.constant 0 : index
    %c0_39 = arith.constant 0 : index
    %98 = vector.load %arg8[%c0_38, %c0_39] : memref<1x32xf32, #tpu.memory_space<vmem>>, vector<1x32xf32>
    %c0_40 = arith.constant 0 : index
    %c0_41 = arith.constant 0 : index
    %99 = vector.load %arg9[%c0_40, %c0_41] : memref<1x32xf32, #tpu.memory_space<vmem>>, vector<1x32xf32>
    %cst_42 = arith.constant dense<0.000000e+00> : vector<16xf32>
    %100 = vector.multi_reduction <add>, %97, %cst_42 [1] : vector<16x32xf32> to vector<16xf32>
    %101 = vector.shape_cast %100 : vector<16xf32> to vector<16x1xf32>
    %cst_43 = arith.constant 3.200000e+01 : f32
    %102 = vector.broadcast %cst_43 : f32 to vector<16x1xf32>
    %103 = arith.divf %101, %102 : vector<16x1xf32>
    %104 = vector.broadcast %103 : vector<16x1xf32> to vector<16x32xf32>
    %105 = arith.subf %97, %104 : vector<16x32xf32>
    %106 = arith.mulf %105, %105 : vector<16x32xf32>
    %cst_44 = arith.constant dense<0.000000e+00> : vector<16xf32>
    %107 = vector.multi_reduction <add>, %106, %cst_44 [1] : vector<16x32xf32> to vector<16xf32>
    %108 = vector.shape_cast %107 : vector<16xf32> to vector<16x1xf32>
    %cst_45 = arith.constant 3.200000e+01 : f32
    %109 = vector.broadcast %cst_45 : f32 to vector<16x1xf32>
    %110 = arith.divf %108, %109 : vector<16x1xf32>
    %111 = vector.broadcast %103 : vector<16x1xf32> to vector<16x32xf32>
    %112 = arith.subf %97, %111 : vector<16x32xf32>
    %cst_46 = arith.constant 9.99999974E-6 : f32
    %113 = vector.broadcast %cst_46 : f32 to vector<16x1xf32>
    %114 = arith.addf %110, %113 : vector<16x1xf32>
    %115 = math.rsqrt %114 : vector<16x1xf32>
    %116 = vector.broadcast %115 : vector<16x1xf32> to vector<16x32xf32>
    %117 = arith.mulf %112, %116 : vector<16x32xf32>
    %118 = vector.broadcast %98 : vector<1x32xf32> to vector<16x32xf32>
    %119 = arith.mulf %117, %118 : vector<16x32xf32>
    %120 = vector.broadcast %99 : vector<1x32xf32> to vector<16x32xf32>
    %121 = arith.addf %119, %120 : vector<16x32xf32>
    %c0_47 = arith.constant 0 : index
    %c0_48 = arith.constant 0 : index
    %122 = vector.load %arg10[%c0_47, %c0_48] : memref<32x128xf32, #tpu.memory_space<vmem>>, vector<32x128xf32>
    %cst_49 = arith.constant dense<0.000000e+00> : vector<16x128xf32>
    %123 = tpu.matmul %121, %122, %cst_49 {dimension_numbers = #tpu.dot_dimension_numbers<[1], [0], [0], [1], [0, 0, 1, 1], [], []>} : vector<16x32xf32>, vector<32x128xf32>, vector<16x128xf32> -> vector<16x128xf32>
    %c0_50 = arith.constant 0 : index
    %c0_51 = arith.constant 0 : index
    %124 = vector.load %arg11[%c0_50, %c0_51] : memref<1x128xf32, #tpu.memory_space<vmem>>, vector<1x128xf32>
    %125 = vector.broadcast %124 : vector<1x128xf32> to vector<16x128xf32>
    %126 = arith.addf %123, %125 : vector<16x128xf32>
    %cst_52 = arith.constant 0.000000e+00 : f32
    %127 = vector.broadcast %cst_52 : f32 to vector<16x128xf32>
    %128 = arith.maximumf %126, %127 : vector<16x128xf32>
    %c0_53 = arith.constant 0 : index
    %c0_54 = arith.constant 0 : index
    %129 = vector.load %arg12[%c0_53, %c0_54] : memref<128x32xf32, #tpu.memory_space<vmem>>, vector<128x32xf32>
    %cst_55 = arith.constant dense<0.000000e+00> : vector<16x32xf32>
    %130 = tpu.matmul %128, %129, %cst_55 {dimension_numbers = #tpu.dot_dimension_numbers<[1], [0], [0], [1], [0, 0, 1, 1], [], []>} : vector<16x128xf32>, vector<128x32xf32>, vector<16x32xf32> -> vector<16x32xf32>
    %c0_56 = arith.constant 0 : index
    %c0_57 = arith.constant 0 : index
    %131 = vector.load %arg13[%c0_56, %c0_57] : memref<1x32xf32, #tpu.memory_space<vmem>>, vector<1x32xf32>
    %132 = vector.broadcast %131 : vector<1x32xf32> to vector<16x32xf32>
    %133 = arith.addf %130, %132 : vector<16x32xf32>
    %134 = arith.addf %133, %121 : vector<16x32xf32>
    %c0_58 = arith.constant 0 : index
    %c0_59 = arith.constant 0 : index
    %135 = vector.load %arg14[%c0_58, %c0_59] : memref<1x32xf32, #tpu.memory_space<vmem>>, vector<1x32xf32>
    %c0_60 = arith.constant 0 : index
    %c0_61 = arith.constant 0 : index
    %136 = vector.load %arg15[%c0_60, %c0_61] : memref<1x32xf32, #tpu.memory_space<vmem>>, vector<1x32xf32>
    %cst_62 = arith.constant dense<0.000000e+00> : vector<16xf32>
    %137 = vector.multi_reduction <add>, %134, %cst_62 [1] : vector<16x32xf32> to vector<16xf32>
    %138 = vector.shape_cast %137 : vector<16xf32> to vector<16x1xf32>
    %cst_63 = arith.constant 3.200000e+01 : f32
    %139 = vector.broadcast %cst_63 : f32 to vector<16x1xf32>
    %140 = arith.divf %138, %139 : vector<16x1xf32>
    %141 = vector.broadcast %140 : vector<16x1xf32> to vector<16x32xf32>
    %142 = arith.subf %134, %141 : vector<16x32xf32>
    %143 = arith.mulf %142, %142 : vector<16x32xf32>
    %cst_64 = arith.constant dense<0.000000e+00> : vector<16xf32>
    %144 = vector.multi_reduction <add>, %143, %cst_64 [1] : vector<16x32xf32> to vector<16xf32>
    %145 = vector.shape_cast %144 : vector<16xf32> to vector<16x1xf32>
    %cst_65 = arith.constant 3.200000e+01 : f32
    %146 = vector.broadcast %cst_65 : f32 to vector<16x1xf32>
    %147 = arith.divf %145, %146 : vector<16x1xf32>
    %148 = vector.broadcast %140 : vector<16x1xf32> to vector<16x32xf32>
    %149 = arith.subf %134, %148 : vector<16x32xf32>
    %cst_66 = arith.constant 9.99999974E-6 : f32
    %150 = vector.broadcast %cst_66 : f32 to vector<16x1xf32>
    %151 = arith.addf %147, %150 : vector<16x1xf32>
    %152 = math.rsqrt %151 : vector<16x1xf32>
    %153 = vector.broadcast %152 : vector<16x1xf32> to vector<16x32xf32>
    %154 = arith.mulf %149, %153 : vector<16x32xf32>
    %155 = vector.broadcast %135 : vector<1x32xf32> to vector<16x32xf32>
    %156 = arith.mulf %154, %155 : vector<16x32xf32>
    %157 = vector.broadcast %136 : vector<1x32xf32> to vector<16x32xf32>
    %158 = arith.addf %156, %157 : vector<16x32xf32>
    %c0_67 = arith.constant 0 : index
    %c0_68 = arith.constant 0 : index
    %159 = vector.load %arg16[%c0_67, %c0_68] : memref<16x32xf32, #tpu.memory_space<vmem>>, vector<16x32xf32>
    tpu.vector_store %arg16[%c0_67, %c0_68], %158 {strides = array<i32>} : memref<16x32xf32, #tpu.memory_space<vmem>>, vector<16x32xf32>,
    return
  }
}

</mosaic_0001>

<bundles_post_ra>
// kernel: tpu_custom_call.1
= control target key start
LH: loop header
LB: loop body
LE: loop exit
PB: predicated region body
PF: predicated region fallthrough
CT: control target
= control target key end

     0   :  { %s2986_s0 = inlined_call_operand.vmem [shape: f32[16,16], index: 0, kind: input, shape index: {}]   ;;  %s2987_s1 = inlined_call_operand.vmem [shape: f32[16,4], index: 1, kind: input, shape index: {}]   ;;  %s2988_s2 = inlined_call_operand.vmem [shape: f32[4,32], index: 2, kind: input, shape index: {}]   ;;  %s2989_s3 = inlined_call_operand.vmem [shape: f32[1,32], index: 3, kind: input, shape index: {}]   ;;  %s2990_s4 = inlined_call_operand.vmem [shape: f32[32,300], index: 4, kind: input, shape index: {}]   ;;  %s2991_s5 = inlined_call_operand.vmem [shape: f32[1,300], index: 5, kind: input, shape index: {}]   ;;  %s2992_s6 = inlined_call_operand.vmem [shape: f32[100,32], index: 6, kind: input, shape index: {}]   ;;  %s2993_s7 = inlined_call_operand.vmem [shape: f32[1,32], index: 7, kind: input, shape index: {}]   ;;  %s2994_s8 = inlined_call_operand.vmem [shape: f32[1,32], index: 8, kind: input, shape index: {}]   ;;  %s2995_s9 = inlined_call_operand.vmem [shape: f32[1,32], index: 9, kind: input, shape index: {}]   ;;  %s2996_s10 = inlined_call_operand.vmem [shape: f32[32,128], index: 10, kind: input, shape index: {}]   ;;  %s2997_s11 = inlined_call_operand.vmem [shape: f32[1,128], index: 11, kind: input, shape index: {}]   ;;  %s2998_s12 = inlined_call_operand.vmem [shape: f32[128,32], index: 12, kind: input, shape index: {}]   ;;  %s2999_s13 = inlined_call_operand.vmem [shape: f32[1,32], index: 13, kind: input, shape index: {}]   ;;  %s3000_s14 = inlined_call_operand.vmem [shape: f32[1,32], index: 14, kind: input, shape index: {}]   ;;  %s3001_s15 = inlined_call_operand.vmem [shape: f32[1,32], index: 15, kind: input, shape index: {}]   ;;  %s3002_s16 = inlined_call_operand.hbm [shape: f32[16,32], index: 16, kind: output, shape index: {}]  }
   0x1   :  { %3004 = sst [smem:[#allocation5_spill]] %s2986_s0 }
   0x2   :  { %v56_v0 = vld [vmem:[%s2988_s2] sm:$0xf]  ;;  %vm64_vm0 = vcmask 1043456   ;;  %vm57_vm1 = vcmask 31744   ;;  %v55_v2 = vld [vmem:[%s2987_s1 + $0x8] sm:$0xff] }
   0x3   :  { %v54_v1 = vld [vmem:[%s2987_s1] sm:$0xff]  ;;  %2033 = vmatprep.subr.msk.mxu0 %vm64_vm0, %v56_v0 }
   0x4   :  { %2035 = vmatprep.mubr.msk.f32.mxu0 %vm57_vm1, %v54_v1 }
   0x5   :  { %21 = vsyncpa [#allocation3], 0  ;;  %2034 = vmatpush3.msk.msra.mxu0 %vm64_vm0, %v56_v0  ;;  %s3005_s2 = sld [smem:[#allocation5_spill]]  ;;  %vm152_vm2 = vcmask 130048   ;;  %v235_v4 = vld [vmem:[%s2990_s4 + $0x8] sm:$0xff]  ;;  %v238_v5 = vld [vmem:[%s2990_s4 + $0x20] sm:$0xff]  ;;  %v248_v32 = vlaneseq }
   0x6   :  { %2036 = vmatmul.mubr.msk.f32.vlgmr.msra.gmra.mrb[0].mxu0 %vm57_vm1, %v55_v2  ;;  %v2205_v9 = vpack.c.bf16 %v238_v5, %v235_v4  ;;  %v234_v10 = vld [vmem:[%s2990_s4] sm:$0xff]  ;;  %v237_v11 = vld [vmem:[%s2990_s4 + $0x18] sm:$0xff]  ;;  %v244_v15 = vld [vmem:[%s2990_s4 + $0x50] sm:$0xff]  ;;  %v2488_v23 = vmov 0.0   ;;  %vm263_vm3 = vcmask 261120   ;;  %vm428_vm4 = vcmask 162816  }
   0x7   :  { %v2207_v13 = vpack.c.bf16 %v237_v11, %v234_v10  ;;  %v241_v14 = vld [vmem:[%s2990_s4 + $0x38] sm:$0xff]  ;;  %v240_v17 = vld [vmem:[%s2990_s4 + $0x30] sm:$0xff]  ;;  %v243_v18 = vld [vmem:[%s2990_s4 + $0x48] sm:$0xff]  ;;  %v249_v33 = vshrl.u32 %v248_v32, 7  ;;  %s2490_s24 = smov 56   ;;  %s2491_s25 = smov 8  }
   0x8   :  { %v2209_v16 = vpack.c.bf16 %v244_v15, %v241_v14  ;;  %v2211_v19 = vpack.c.bf16 %v243_v18, %v240_v17  ;;  %v236_v20 = vld [vmem:[%s2990_s4 + $0x10] sm:$0xff]  ;;  %v239_v21 = vld [vmem:[%s2990_s4 + $0x28] sm:$0xff]  ;;  %v1892_v24 = vld [vmem:[%s2989_s3] ss:$0 sm:$0xff]  ;;  %s2492_s26 = smov 36   ;;  %s2493_s27 = smov 108  }
   0x9   :  { %v2213_v22 = vpack.c.bf16 %v239_v21, %v236_v20  ;;  %v242_v25 = vld [vmem:[%s2990_s4 + $0x40] sm:$0xff]  ;;  %v245_v26 = vld [vmem:[%s2990_s4 + $0x58] sm:$0xff]  ;;  %v250_v34 = vsub.s32 0, %v249_v33  ;;  %v254_v37 = vsub.s32 1, %v249_v33  ;;  %v258_v41 = vsub.s32 2, %v249_v33  ;;  %vm2697_vm5 = vmpackc.low %vm428_vm4, %vm428_vm4  ;;  %s2494_s28 = smov 116  }
   0xa   :  { %v2217_v30 = vpack.c.bf16 %v245_v26, %v242_v25  ;;  %v246_v35 = vld [vmem:[%s2991_s5] sm:$0x7]  ;;  %s2489_s5 = smov 28   ;;  %vm635_vm6 = vcmask 64512   ;;  %s2495_s29 = smov 88   ;;  %vm1472_vm7 = vcmask 326656  }
   0xb   :  { %v143_v3 = vld [vmem:[%s3005_s2] sm:$0xff]  ;;  %v144_v12 = vld [vmem:[%s3005_s2 + $0x8] sm:$0xff]  ;;  %v251_v36 = vrot.slane %v246_v35, %v250_v34  ;;  %v255_v42 = vrot.slane %v246_v35, %v254_v37  ;;  %v259_v46 = vrot.slane %v246_v35, %v258_v41  ;;  %s2496_s2 = smov 16   ;;  %s2497_s30 = smov 68   ;;  %vm1475_vm8 = vcmask 490496  }
   0xc   :  { %2042 = vmatprep.mubr.msk.f32.mxu1 %vm152_vm2, %v143_v3  ;;  %s2498_s0 = smov 96   ;;  %s2499_s1 = smov 124   ;;  %vm1478_vm9 = vcmask 654336   ;;  %vm1501_vm10 = vcmask 818176  }
   0xd   :  { %s2500_s17 = smov 48   ;;  %s2501_s18 = smov 76  }
   0xe   :  { %s2502_s19 = smov 104   ;;  %s2503_s20 = smov 20  }
   0xf   :  { %s2504_s21 = smov 60   ;;  %s2505_s22 = smov 40  }
  0xd9   :  { %v2037_v6 = vpop.f32.mrb[0].mxu0 }
  0xda   :  { %v134_v7 = vpop.f32.mrb[1].mxu0 }
  0xdb   :  { %v2201_v8 = vpack.c.bf16 %v2037_v6, %v134_v7 }
  0xdd   :  { %2202 = vmatprep.subr.bf16.mxu1 %v2201_v8 }
  0xde   :  { %2204 = vmatpush3.bf16.msra.mxu1 %v2201_v8 }
  0xdf   :  { %2206 = vmatprep.subr.bf16.mxu1 %v2205_v9 }
  0xe1   :  { %2043 = vmatmul.mubr.msk.f32.vlgmr.msra.gmra.mrb[0].mxu1 %vm152_vm2, %v144_v12 }
  0xe2   :  { %2208 = vmatpush1.bf16.msra.mxu1 %v2207_v13  ;;  %334 = vmatprep.mubr.f32.mxu1 %v2488_v23 }
  0xe3   :  { %2210 = vmatprep.subr.bf16.mxu1 %v2209_v16 }
  0xe6   :  { %2212 = vmatpush1.bf16.msra.mxu1 %v2211_v19 }
  0xe7   :  { %2214 = vmatprep.subr.bf16.mxu1 %v2213_v22 }
 0x1b4   :  { %v2044_v27 = vpop.f32.mrb[0].mxu1 }
 0x1b5   :  { %v225_v28 = vpop.f32.mrb[1].mxu1  ;;  %v2656_v31 = vadd.f32 %v2044_v27, %v1892_v24 }
 0x1b6   :  { %v2652_v29 = vadd.f32 %v1892_v24, %v225_v28 }
 0x1b8   :  { %1895 = vmatmul.mubr.msk.f32.vlgmr.msra.gmra.mrb[2].mxu1 %vm263_vm3, %v2652_v29 }
 0x1b9   :  { %2216 = vmatpush3.bf16.msra.mxu1 %v2213_v22  ;;  %340 = vmatprep.mubr.f32.mxu1 %v2488_v23 }
 0x1ba   :  { %2218 = vmatprep.subr.bf16.mxu1 %v2217_v30 }
 0x1bc   :  { %1896 = vmatmul.mubr.msk.f32.gmra.mrb[4].mxu1 %vm263_vm3, %v2656_v31 }
 0x1bd   :  { %2220 = vmatpush3.bf16.msra.mxu1 %v2217_v30  ;;  %2053 = vmatprep.mubr.msk.f32.mxu1 %vm263_vm3, %v2652_v29 }
 0x1c0   :  { %2054 = vmatmul.mubr.msk.f32.vlgmr.msra.gmra.mrb[6].mxu1 %vm263_vm3, %v2656_v31 }
 0x28b   :  { %v336_v38 = vpop.f32.mrb[2].mxu1 }
 0x28c   :  { %v2667_v39 = vadd.f32 %v336_v38, %v251_v36  ;;  %v338_v40 = vpop.f32.mrb[3].mxu1 }
 0x28d   :  { %v2673_v47 = vadd.f32 %v338_v40, %v255_v42 }
 0x28e   :  { %2060 = vmatprep.mubr.msk.f32.mxu0 %vm428_vm4, %v2667_v39 }
 0x28f   :  { %v342_v43 = vpop.f32.mrb[4].mxu1  ;;  %v2366_v3 = vpack.i.bf16 %v2673_v47, %v2667_v39 }
 0x290   :  { %v2671_v44 = vadd.f32 %v342_v43, %v251_v36  ;;  %v344_v45 = vpop.f32.mrb[5].mxu1 }
 0x291   :  { %v2675_v48 = vadd.f32 %v344_v45, %v255_v42 }
 0x292   :  { %v2356_v49 = vpack.i.bf16 %v2671_v44, %v2667_v39 }
 0x293   :  { %v2055_v50 = vpop.f32.mrb[6].mxu1  ;;  %v2681_v51 = vpack.i.bf16 %v2675_v48, %v2673_v47  ;;  %v2371_v4 = vpack.i.bf16 %v2675_v48, %v2671_v44 }
 0x294   :  { %v2683_v52 = vadd.f32 %v2055_v50, %v259_v46  ;;  %v413_v53 = vpop.f32.mrb[7].mxu1  ;;  %2357 = vrot.lane.b32.xlu0 %v2356_v49, %s2489_s5 }
 0x295   :  { %v2685_v54 = vadd.f32 %v413_v53, %v259_v46 }
 0x296   :  { %v2391_v55 = vpack.i.bf16 %v2683_v52, %v2675_v48 }
 0x297   :  { %v2386_v56 = vpack.i.bf16 %v2685_v54, %v2673_v47  ;;  %v2693_v57 = vpack.i.bf16 %v2683_v52, %v2685_v54 }
 0x306   :  { %v2358_v58 = vpop.permute.xlu0 %2357 }
 0x307   :  { %v2360_v59 = vunpack.i.h.bf16 %v2358_v58  ;;  %v2359_v60 = vunpack.i.l.bf16 %v2358_v58 }
 0x309   :  { %v2221_v62 = vpack.c.bf16 %v2360_v59, %v2359_v60 }
 0x30b   :  { %2223 = vmatprep.subr.msk.bf16.mxu0 %vm2697_vm5, %v2221_v62 }
 0x30c   :  { %2226 = vmatpush3.bf16.xpose.msk.msra.mxu0 %vm2697_vm5, %v2221_v62 }
 0x313   :  { %2061 = vmatmul.mubr.msk.f32.vlgmr.msra.gmra.mrb[2].mxu0 %vm428_vm4, %v2671_v44 }
 0x3e6   :  { %v2062_v63 = vpop.f32.mrb[2].mxu0 }
 0x3e7   :  { %v503_v0 = vpop.f32.mrb[3].mxu0  ;;  %v515_v1 = vsel %vm152_vm2, %v2062_v63, -inf }
 0x3e8   :  { %516 = vmax.xlane.f32.xlu1 %v515_v1  ;;  %v512_v2 = vsel %vm152_vm2, %v503_v0, -inf }
 0x3e9   :  { %513 = vmax.xlane.f32.xlu0 %v512_v2 }
 0x3f9   :  { %2362 = vrot.lane.b32.xlu1 %v2681_v51, %s2490_s24 }
 0x3fd   :  { %2367 = vrot.lane.b32.xlu1 %v2366_v3, %s2491_s25 }
 0x3ff   :  { %2377 = vrot.lane.b32.xlu0 %v2681_v51, %s2492_s26 }
 0x401   :  { %2372 = vrot.lane.b32.xlu1 %v2371_v4, %s2491_s25 }
 0x405   :  { %623 = vrot.lane.b32.xlu1 %v2667_v39, %s2493_s27 }
 0x409   :  { %625 = vrot.lane.b32.xlu1 %v2671_v44, %s2493_s27 }
 0x475   :  { %v517_v5 = vpop.xlane.xlu1 %516 }
 0x476   :  { %v519_v6 = vsub.f32 %v2062_v63, %v517_v5  ;;  %v514_v7 = vpop.xlane.xlu0 %513 }
 0x477   :  { %v518_v8 = vsub.f32 %v503_v0, %v514_v7 }
 0x478   :  { %v522_v9 = vmul.f32 1.442695, %v519_v6 }
 0x479   :  { %v520_v10 = vmul.f32 1.442695, %v518_v8  ;;  %v2363_v11 = vpop.permute.xlu1 %2362 }
 0x47a   :  { %v2365_v12 = vunpack.i.h.bf16 %v2363_v11  ;;  %v2364_v13 = vunpack.i.l.bf16 %v2363_v11  ;;  %v2378_v14 = vpop.permute.xlu0 %2377 }
 0x47b   :  { %2416 = vpow2.f32 %v520_v10  ;;  %v2380_v15 = vunpack.i.h.bf16 %v2378_v14  ;;  %v2379_v16 = vunpack.i.l.bf16 %v2378_v14 }
 0x47c   :  { %2418 = vpow2.f32 %v522_v9  ;;  %v2227_v17 = vpack.c.bf16 %v2365_v12, %v2364_v13 }
 0x47d   :  { %v2237_v18 = vpack.c.bf16 %v2380_v15, %v2379_v16  ;;  %v2368_v19 = vpop.permute.xlu1 %2367 }
 0x47e   :  { %2228 = vmatprep.subr.bf16.mxu1 %v2227_v17  ;;  %v2370_v20 = vunpack.i.h.bf16 %v2368_v19  ;;  %v2369_v21 = vunpack.i.l.bf16 %v2368_v19 }
 0x47f   :  { %2230 = vmatpush3.bf16.msra.mxu1 %v2227_v17  ;;  %2238 = vmatprep.subr.bf16.mxu0 %v2237_v18 }
 0x480   :  { %2240 = vmatpush3.bf16.msra.mxu0 %v2237_v18  ;;  %v636_v25 = vsel %vm635_vm6, %v2369_v21, %v2370_v20 }
 0x481   :  { %v2373_v22 = vpop.permute.xlu1 %2372 }
 0x482   :  { %v2375_v23 = vunpack.i.h.bf16 %v2373_v22  ;;  %v2374_v24 = vunpack.i.l.bf16 %v2373_v22 }
 0x484   :  { %v637_v26 = vsel %vm635_vm6, %v2374_v24, %v2375_v23 }
 0x485   :  { %v2719_v27 = vpop.eup %2416  ;;  %v2231_v28 = vpack.c.bf16 %v637_v26, %v636_v25  ;;  %v624_v32 = vpop.permute.xlu1 %623 }
 0x486   :  { %v2721_v30 = vpop.eup %2418  ;;  %2067 = vmatprep.mubr.msk.f32.mxu1 %vm152_vm2, %v2719_v27 }
 0x487   :  { %2068 = vmatmul.mubr.msk.f32.vlgmr.msra.gmra.mrb[8].mxu1 %vm152_vm2, %v2721_v30  ;;  %2233 = vmatprep.subr.msk.bf16.mxu1 %vm2697_vm5, %v2231_v28 }
 0x488   :  { %2236 = vmatpush3.bf16.xpose.msk.msra.mxu1 %vm2697_vm5, %v2231_v28  ;;  %2074 = vmatprep.mubr.msk.f32.mxu1 %vm428_vm4, %v624_v32 }
 0x489   :  { %v626_v33 = vpop.permute.xlu1 %625 }
 0x48f   :  { %2075 = vmatmul.mubr.msk.f32.vlgmr.msra.gmra.mrb[10].mxu1 %vm428_vm4, %v626_v33 }
 0x55a   :  { %v2733_v34 = vpop.f32.mrb[8].mxu1 }
 0x55b   :  { %v2735_v35 = vpop.f32.mrb[9].mxu1 }
 0x562   :  { %v2076_v36 = vpop.f32.mrb[10].mxu1 }
 0x563   :  { %v712_v37 = vpop.f32.mrb[11].mxu1  ;;  %v724_v38 = vsel %vm152_vm2, %v2076_v36, -inf }
 0x564   :  { %725 = vmax.xlane.f32.xlu1 %v724_v38  ;;  %v721_v40 = vsel %vm152_vm2, %v712_v37, -inf }
 0x565   :  { %722 = vmax.xlane.f32.xlu0 %v721_v40 }
 0x57b   :  { %2382 = vrot.lane.b32.xlu0 %v2681_v51, %s2494_s28  ;;  %s2506_s28 = smov 80  }
 0x57f   :  { %830 = vrot.lane.b32.xlu0 %v2667_v39, %s2495_s29 }
 0x583   :  { %832 = vrot.lane.b32.xlu0 %v2671_v44, %s2495_s29 }
 0x5f1   :  { %v726_v41 = vpop.xlane.xlu1 %725 }
 0x5f2   :  { %v728_v42 = vsub.f32 %v2076_v36, %v726_v41  ;;  %v723_v43 = vpop.xlane.xlu0 %722 }
 0x5f3   :  { %v727_v45 = vsub.f32 %v712_v37, %v723_v43 }
 0x5f4   :  { %v731_v46 = vmul.f32 1.442695, %v728_v42 }
 0x5f5   :  { %v729_v49 = vmul.f32 1.442695, %v727_v45 }
 0x5f6   :  { %v2383_v50 = vpop.permute.xlu0 %2382 }
 0x5f7   :  { %2420 = vpow2.f32 %v729_v49  ;;  %v2385_v53 = vunpack.i.h.bf16 %v2383_v50  ;;  %v2384_v58 = vunpack.i.l.bf16 %v2383_v50 }
 0x5f8   :  { %2422 = vpow2.f32 %v731_v46 }
 0x5f9   :  { %v2241_v59 = vpack.c.bf16 %v2385_v53, %v2384_v58 }
 0x5fa   :  { %v831_v63 = vpop.permute.xlu0 %830 }
 0x5fb   :  { %2243 = vmatprep.subr.msk.bf16.mxu0 %vm2697_vm5, %v2241_v59 }
 0x5fe   :  { %v833_v0 = vpop.permute.xlu0 %832 }
 0x601   :  { %v2744_v60 = vpop.eup %2420 }
 0x602   :  { %v2746_v62 = vpop.eup %2422  ;;  %2081 = vmatprep.mubr.msk.f32.mxu0 %vm152_vm2, %v2744_v60  ;;  %v820_v61 = vsel %vm152_vm2, %v2744_v60, 0.0 }
 0x603   :  { %2082 = vmatmul.mubr.msk.f32.vlgmr.msra.gmra.mrb[4].mxu0 %vm152_vm2, %v2746_v62 }
 0x604   :  { %2246 = vmatpush3.bf16.xpose.msk.msra.mxu0 %vm2697_vm5, %v2241_v59  ;;  %2088 = vmatprep.mubr.msk.f32.mxu0 %vm428_vm4, %v831_v63 }
 0x60b   :  { %2089 = vmatmul.mubr.msk.f32.vlgmr.msra.gmra.mrb[6].mxu0 %vm428_vm4, %v833_v0 }
 0x6d6   :  { %v2756_v1 = vpop.f32.mrb[4].mxu0 }
 0x6d7   :  { %v2758_v2 = vpop.f32.mrb[5].mxu0 }
 0x6de   :  { %v2090_v3 = vpop.f32.mrb[6].mxu0 }
 0x6df   :  { %v912_v4 = vpop.f32.mrb[7].mxu0  ;;  %v924_v5 = vsel %vm152_vm2, %v2090_v3, -inf }
 0x6e0   :  { %925 = vmax.xlane.f32.xlu1 %v924_v5  ;;  %v921_v6 = vsel %vm152_vm2, %v912_v4, -inf }
 0x6e1   :  { %922 = vmax.xlane.f32.xlu0 %v921_v6 }
 0x6f1   :  { %2387 = vrot.lane.b32.xlu1 %v2386_v56, %s2496_s2 }
 0x6f5   :  { %2392 = vrot.lane.b32.xlu1 %v2391_v55, %s2496_s2  ;;  %s2507_s2 = smov [#allocation2]  }
 0x6f7   :  { %1040 = vrot.lane.b32.xlu0 %v2671_v44, %s2497_s30 }
 0x6f9   :  { %2397 = vrot.lane.b32.xlu1 %v2681_v51, %s2498_s0 }
 0x6fd   :  { %1038 = vrot.lane.b32.xlu1 %v2667_v39, %s2497_s30  ;;  %s1878_s30 = sshll.u32 %s2507_s2, 4  ;;  %s1879_s30 = int_to_ptr.vmem [resolvable:$true] %s1878_s30 }
 0x6fe   :  { %s2464_s0 = scalar_lea.vmem %s1879_s30, 256  ;;  %p2469_p1 = scmp.lt.s32.totalorder %s1879_s30, %s1879_s30 }
 0x6ff   :  { %p2465_p0 = scmp.ne.s32.totalorder %s1879_s30, %s2464_s0  ;;  %p2470_p2 = scmp.lt.s32.totalorder %s2464_s0, %s2464_s0 }
 0x701   :  { %2402 = vrot.lane.b32.xlu1 %v2693_v57, %s2499_s1  ;;  %p2471_p3 = por %p2470_p2, %p2469_p1 }
 0x703   :  { %p2472_p4 = pnand %p2471_p3, %p2465_p0 }
 0x76d   :  { %v926_v7 = vpop.xlane.xlu1 %925 }
 0x76e   :  { %v928_v8 = vsub.f32 %v2090_v3, %v926_v7  ;;  %v923_v9 = vpop.xlane.xlu0 %922 }
 0x76f   :  { %v927_v47 = vsub.f32 %v912_v4, %v923_v9 }
 0x770   :  { %v931_v54 = vmul.f32 1.442695, %v928_v8  ;;  %v823_v8 = vsel %vm152_vm2, %v2746_v62, 0.0 }
 0x771   :  { %v929_v56 = vmul.f32 1.442695, %v927_v47  ;;  %v2388_v10 = vpop.permute.xlu1 %2387 }
 0x772   :  { %v2390_v48 = vunpack.i.h.bf16 %v2388_v10  ;;  %v2389_v52 = vunpack.i.l.bf16 %v2388_v10  ;;  %v1041_v28 = vpop.permute.xlu0 %1040 }
 0x773   :  { %2424 = vpow2.f32 %v929_v56 }
 0x774   :  { %2426 = vpow2.f32 %v931_v54  ;;  %v943_v13 = vsel %vm152_vm2, %v2389_v52, %v2390_v48 }
 0x775   :  { %v2393_v55 = vpop.permute.xlu1 %2392 }
 0x776   :  { %v2395_v11 = vunpack.i.h.bf16 %v2393_v55  ;;  %v2394_v12 = vunpack.i.l.bf16 %v2393_v55 }
 0x778   :  { %v944_v14 = vsel %vm152_vm2, %v2394_v12, %v2395_v11 }
 0x779   :  { %v2398_v15 = vpop.permute.xlu1 %2397  ;;  %v2247_v16 = vpack.c.bf16 %v944_v14, %v943_v13 }
 0x77a   :  { %v2400_v17 = vunpack.i.h.bf16 %v2398_v15  ;;  %v2399_v18 = vunpack.i.l.bf16 %v2398_v15 }
 0x77b   :  { %2248 = vmatprep.subr.bf16.mxu1 %v2247_v16 }
 0x77c   :  { %v2251_v19 = vpack.c.bf16 %v2400_v17, %v2399_v18  ;;  %2250 = vmatpush3.bf16.msra.mxu1 %v2247_v16 }
 0x77d   :  { %v2774_v20 = vpop.eup %2424  ;;  %v1039_v21 = vpop.permute.xlu1 %1038 }
 0x77e   :  { %v2776_v22 = vpop.eup %2426  ;;  %2095 = vmatprep.mubr.msk.f32.mxu1 %vm152_vm2, %v2774_v20  ;;  %2253 = vmatprep.subr.msk.bf16.mxu1 %vm2697_vm5, %v2251_v19  ;;  %v1028_v9 = vsel %vm152_vm2, %v2774_v20, 0.0 }
 0x77f   :  { %2096 = vmatmul.mubr.msk.f32.vlgmr.msra.gmra.mrb[12].mxu1 %vm152_vm2, %v2776_v22  ;;  %v1031_v60 = vsel %vm152_vm2, %v2776_v22, 0.0 }
 0x780   :  { %2102 = vmatprep.mubr.msk.f32.mxu1 %vm428_vm4, %v1039_v21 }
 0x781   :  { %v2403_v23 = vpop.permute.xlu1 %2402 }
 0x782   :  { %v2405_v24 = vunpack.i.h.bf16 %v2403_v23  ;;  %v2404_v25 = vunpack.i.l.bf16 %v2403_v23 }
 0x784   :  { %v2257_v26 = vpack.c.bf16 %v2405_v24, %v2404_v25  ;;  %v613_v24 = vsel %vm152_vm2, %v2719_v27, 0.0 }
 0x785   :  { %2256 = vmatpush3.bf16.xpose.msk.msra.mxu1 %vm2697_vm5, %v2251_v19 }
 0x786   :  { %2258 = vmatprep.subr.bf16.mxu0 %v2257_v26 }
 0x787   :  { %2260 = vmatpush3.bf16.msra.mxu0 %v2257_v26 }
 0x78c   :  { %2103 = vmatmul.mubr.msk.f32.vlgmr.msra.gmra.mrb[14].mxu1 %vm428_vm4, %v1041_v28  ;;  %v616_v28 = vsel %vm152_vm2, %v2721_v30, 0.0 }
 0x852   :  { %v2788_v32 = vpop.f32.mrb[12].mxu1 }
 0x853   :  { %v2790_v33 = vpop.f32.mrb[13].mxu1 }
 0x85f   :  { %v2104_v36 = vpop.f32.mrb[14].mxu1 }
 0x860   :  { %v1120_v37 = vpop.f32.mrb[15].mxu1  ;;  %v1132_v38 = vsel %vm152_vm2, %v2104_v36, -inf }
 0x861   :  { %1133 = vmax.xlane.f32.xlu0 %v1132_v38  ;;  %v1129_v40 = vsel %vm152_vm2, %v1120_v37, -inf }
 0x862   :  { %1130 = vmax.xlane.f32.xlu1 %v1129_v40 }
 0x873   :  { %1238 = vrot.lane.b32.xlu1 %v2667_v39, %s2500_s17 }
 0x877   :  { %2407 = vrot.lane.b32.xlu0 %v2681_v51, %s2501_s18  ;;  %1240 = vrot.lane.b32.xlu1 %v2671_v44, %s2500_s17 }
 0x8ee   :  { %v1134_v41 = vpop.xlane.xlu0 %1133 }
 0x8ef   :  { %v1136_v42 = vsub.f32 %v2104_v36, %v1134_v41  ;;  %v1131_v43 = vpop.xlane.xlu1 %1130 }
 0x8f0   :  { %v1135_v45 = vsub.f32 %v1120_v37, %v1131_v43 }
 0x8f1   :  { %v1139_v46 = vmul.f32 1.442695, %v1136_v42 }
 0x8f2   :  { %v1137_v49 = vmul.f32 1.442695, %v1135_v45  ;;  %v2408_v50 = vpop.permute.xlu0 %2407  ;;  %v1483_v45 = vld [vmem:[%s2992_s6 + $0x10] sm:$0xff] }
 0x8f3   :  { %v2410_v53 = vunpack.i.h.bf16 %v2408_v50  ;;  %v2409_v58 = vunpack.i.l.bf16 %v2408_v50  ;;  %v1239_v44 = vpop.permute.xlu1 %1238  ;;  %v1485_v50 = vld [vmem:[%s2992_s6 + $0x20] sm:$0xff] }
 0x8f4   :  { %2428 = vpow2.f32 %v1137_v49 }
 0x8f5   :  { %2430 = vpow2.f32 %v1139_v46  ;;  %v2261_v59 = vpack.c.bf16 %v2410_v53, %v2409_v58  ;;  %v1486_v53 = vld [vmem:[%s2992_s6 + $0x28] sm:$0xff] }
 0x8f6   :  { %v2279_v58 = vpack.c.bf16 %v1486_v53, %v1485_v50  ;;  %v1635_v53 = vld [vmem:[%s2996_s10 + $0x10] sm:$0xff] }
 0x8f7   :  { %2263 = vmatprep.subr.msk.bf16.mxu0 %vm2697_vm5, %v2261_v59  ;;  %v1241_v51 = vpop.permute.xlu1 %1240 }
 0x8fe   :  { %v2429_v39 = vpop.eup %2428 }
 0x8ff   :  { %v2431_v63 = vpop.eup %2430  ;;  %2109 = vmatprep.mubr.msk.f32.mxu0 %vm152_vm2, %v2429_v39  ;;  %v1228_v47 = vsel %vm152_vm2, %v2429_v39, 0.0  ;;  %v1488_v39 = vld [vmem:[%s2992_s6 + $0x38] sm:$0xff] }
 0x900   :  { %2110 = vmatmul.mubr.msk.f32.vlgmr.msra.gmra.mrb[8].mxu0 %vm152_vm2, %v2431_v63  ;;  %v1231_v54 = vsel %vm152_vm2, %v2431_v63, 0.0 }
 0x901   :  { %2266 = vmatpush3.bf16.xpose.msk.msra.mxu0 %vm2697_vm5, %v2261_v59  ;;  %2116 = vmatprep.mubr.msk.f32.mxu0 %vm428_vm4, %v1239_v44  ;;  %v1487_v59 = vld [vmem:[%s2992_s6 + $0x30] sm:$0xff]  ;;  %v1489_v44 = vld [vmem:[%s2992_s6 + $0x40] sm:$0xff] }
 0x902   :  { %v2283_v63 = vpack.c.bf16 %v1488_v39, %v1487_v59  ;;  %v1727_v39 = vld [vmem:[%s2998_s12] sm:$0xff] }
 0x908   :  { %2117 = vmatmul.mubr.msk.f32.vlgmr.msra.gmra.mrb[10].mxu0 %vm428_vm4, %v1241_v51  ;;  %v1490_v51 = vld [vmem:[%s2992_s6 + $0x48] sm:$0xff] }
 0x9d3   :  { %v2805_v0 = vpop.f32.mrb[8].mxu0 }
 0x9d4   :  { %v1219_v3 = vpop.f32.mrb[9].mxu0 }
 0x9db   :  { %v2118_v4 = vpop.f32.mrb[10].mxu0 }
 0x9dc   :  { %v1320_v5 = vpop.f32.mrb[11].mxu0  ;;  %v1332_v6 = vsel %vm152_vm2, %v2118_v4, -inf }
 0x9dd   :  { %1333 = vmax.xlane.f32.xlu0 %v1332_v6  ;;  %v1329_v7 = vsel %vm152_vm2, %v1320_v5, -inf }
 0x9de   :  { %1330 = vmax.xlane.f32.xlu1 %v1329_v7 }
 0x9e1   :  { %821 = vadd.xlane.f32.xlu0 %v820_v61  ;;  %v1493_v61 = vld [vmem:[%s2992_s6 + $0x60] sm:$0xf] }
 0x9e5   :  { %824 = vadd.xlane.f32.xlu0 %v823_v8 }
 0x9e9   :  { %1029 = vadd.xlane.f32.xlu0 %v1028_v9 }
 0x9ed   :  { %1229 = vadd.xlane.f32.xlu0 %v1228_v47 }
 0x9ef   :  { %2412 = vrot.lane.b32.xlu1 %v2693_v57, %s2502_s19 }
 0x9f1   :  { %1232 = vadd.xlane.f32.xlu0 %v1231_v54 }
 0xa13   :  { %1032 = vadd.xlane.f32.xlu1 %v1031_v60 }
 0xa6a   :  { %v1334_v56 = vpop.xlane.xlu0 %1333 }
 0xa6b   :  { %v1336_v62 = vsub.f32 %v2118_v4, %v1334_v56  ;;  %v1331_v10 = vpop.xlane.xlu1 %1330  ;;  %v1492_v4 = vld [vmem:[%s2992_s6 + $0x58] sm:$0xff] }
 0xa6c   :  { %v1335_v48 = vsub.f32 %v1320_v5, %v1331_v10 }
 0xa6d   :  { %v1339_v52 = vmul.f32 1.442695, %v1336_v62 }
 0xa6e   :  { %v1337_v55 = vmul.f32 1.442695, %v1335_v48  ;;  %v822_v11 = vpop.xlane.xlu0 %821 }
 0xa6f   :  { %v2413_v12 = vpop.permute.xlu1 %2412 }
 0xa70   :  { %2432 = vpow2.f32 %v1337_v55  ;;  %v2415_v13 = vunpack.i.h.bf16 %v2413_v12  ;;  %v2414_v14 = vunpack.i.l.bf16 %v2413_v12 }
 0xa71   :  { %2434 = vpow2.f32 %v1339_v52 }
 0xa72   :  { %v2267_v57 = vpack.c.bf16 %v2415_v13, %v2414_v14  ;;  %v825_v15 = vpop.xlane.xlu0 %824 }
 0xa73   :  { %2436 = vrcp.f32 %v825_v15 }
 0xa74   :  { %2268 = vmatprep.subr.bf16.mxu1 %v2267_v57 }
 0xa75   :  { %2270 = vmatpush3.bf16.msra.mxu1 %v2267_v57 }
 0xa76   :  { %v1030_v16 = vpop.xlane.xlu0 %1029 }
 0xa7a   :  { %v2433_v17 = vpop.eup %2432  ;;  %v1230_v18 = vpop.xlane.xlu0 %1229 }
 0xa7b   :  { %v2435_v19 = vpop.eup %2434  ;;  %2438 = vrcp.f32 %v1230_v18  ;;  %2123 = vmatprep.mubr.msk.f32.mxu1 %vm152_vm2, %v2433_v17  ;;  %v1428_v20 = vsel %vm152_vm2, %v2433_v17, 0.0 }
 0xa7c   :  { %1429 = vadd.xlane.f32.xlu0 %v1428_v20  ;;  %2124 = vmatmul.mubr.msk.f32.vlgmr.msra.gmra.mrb[16].mxu1 %vm152_vm2, %v2435_v19  ;;  %v1431_v23 = vsel %vm152_vm2, %v2435_v19, 0.0  ;;  %2440 = vrcp.f32 %v822_v11 }
 0xa7d   :  { %v2437_v21 = vpop.eup %2436  ;;  %2442 = vrcp.f32 %v1030_v16 }
 0xa7e   :  { %v829_v22 = vmul.f32 %v2437_v21, %v2756_v1  ;;  %v1233_v38 = vpop.xlane.xlu0 %1232 }
 0xa80   :  { %1442 = vrot.lane.b32.xlu1 %v829_v22, %s2503_s20  ;;  %1432 = vadd.xlane.f32.xlu0 %v1431_v23 }
 0xa84   :  { %614 = vadd.xlane.f32.xlu0 %v613_v24 }
 0xa85   :  { %v2439_v25 = vpop.eup %2438 }
 0xa86   :  { %v1236_v26 = vmul.f32 %v2439_v25, %v1219_v3  ;;  %v2441_v1 = vpop.eup %2440  ;;  %v1491_v3 = vld [vmem:[%s2992_s6 + $0x50] sm:$0xff] }
 0xa87   :  { %v828_v36 = vmul.f32 %v2441_v1, %v2758_v2  ;;  %v2443_v37 = vpop.eup %2442  ;;  %v1481_v2 = vld [vmem:[%s2992_s6] sm:$0xff]  ;;  %v2291_v5 = vpack.c.bf16 %v1492_v4, %v1491_v3 }
 0xa88   :  { %1456 = vrot.lane.b32.xlu1 %v1236_v26, %s2504_s21  ;;  %617 = vadd.xlane.f32.xlu0 %v616_v28  ;;  %v1036_v27 = vmul.f32 %v2443_v37, %v2790_v33  ;;  %v1482_v33 = vld [vmem:[%s2992_s6 + $0x8] sm:$0xff] }
 0xa89   :  { %v2271_v46 = vpack.c.bf16 %v1482_v33, %v1481_v2 }
 0xa8b   :  { %2272 = vmatprep.subr.bf16.mxu1 %v2271_v46 }
 0xa8c   :  { %2274 = vmatpush3.bf16.msra.mxu1 %v2271_v46 }
 0xa9e   :  { %1440 = vrot.lane.b32.xlu0 %v828_v36, %s2503_s20 }
 0xaa0   :  { %v1033_v40 = vpop.xlane.xlu1 %1032 }
 0xaa1   :  { %2444 = vrcp.f32 %v1033_v40 }
 0xaa2   :  { %1448 = vrot.lane.b32.xlu0 %v1036_v27, %s2505_s22  ;;  %2446 = vrcp.f32 %v1233_v38 }
 0xaab   :  { %v2445_v41 = vpop.eup %2444 }
 0xaac   :  { %v1037_v30 = vmul.f32 %v2445_v41, %v2788_v32  ;;  %v2447_v42 = vpop.eup %2446  ;;  %v1484_v32 = vld [vmem:[%s2992_s6 + $0x18] sm:$0xff] }
 0xaad   :  { %v1237_v43 = vmul.f32 %v2447_v42, %v2805_v0  ;;  %v2275_v49 = vpack.c.bf16 %v1484_v32, %v1483_v45  ;;  %v2287_v0 = vpack.c.bf16 %v1490_v51, %v1489_v44 }
 0xaae   :  { %1450 = vrot.lane.b32.xlu0 %v1037_v30, %s2505_s22 }
 0xaaf   :  { %2276 = vmatprep.subr.bf16.mxu1 %v2275_v49 }
 0xab0   :  { %2278 = vmatpush3.bf16.msra.mxu1 %v2275_v49  ;;  %v1634_v49 = vld [vmem:[%s2996_s10 + $0x8] sm:$0xff] }
 0xab1   :  { %2280 = vmatprep.subr.bf16.mxu1 %v2279_v58 }
 0xab2   :  { %1458 = vrot.lane.b32.xlu0 %v1237_v43, %s2504_s21 }
 0xab4   :  { %2282 = vmatpush3.bf16.msra.mxu1 %v2279_v58  ;;  %v1636_v58 = vld [vmem:[%s2996_s10 + $0x18] sm:$0xff] }
 0xab5   :  { %2284 = vmatprep.subr.bf16.mxu1 %v2283_v63  ;;  %v2299_v59 = vpack.c.bf16 %v1636_v58, %v1635_v53 }
 0xab8   :  { %2286 = vmatpush3.bf16.msra.mxu1 %v2283_v63  ;;  %v1728_v63 = vld [vmem:[%s2998_s12 + $0x8] sm:$0xff] }
 0xab9   :  { %2288 = vmatprep.subr.bf16.mxu1 %v2287_v0  ;;  %v2303_v44 = vpack.c.bf16 %v1728_v63, %v1727_v39 }
 0xabc   :  { %2290 = vmatpush3.bf16.msra.mxu1 %v2287_v0 }
 0xabd   :  { %2292 = vmatprep.subr.bf16.mxu1 %v2291_v5 }
 0xac0   :  { %2294 = vmatpush3.bf16.msra.mxu1 %v2291_v5 }
 0xac1   :  { %2150 = vmatprep.subr.msk.mxu1 %vm64_vm0, %v1493_v61 }
 0xac4   :  { %2151 = vmatpush3.msk.msra.mxu1 %vm64_vm0, %v1493_v61  ;;  %v1933_v61 = vld [vmem:[%s2994_s8] ss:$0 sm:$0xff] }
 0xaf2   :  { %v1443_v57 = vpop.permute.xlu1 %1442 }
 0xafa   :  { %v1457_v18 = vpop.permute.xlu1 %1456 }
 0xb09   :  { %v1430_v6 = vpop.xlane.xlu0 %1429 }
 0xb0d   :  { %v1433_v7 = vpop.xlane.xlu0 %1432 }
 0xb0e   :  { %2448 = vrcp.f32 %v1433_v7 }
 0xb0f   :  { %2450 = vrcp.f32 %v1430_v6 }
 0xb11   :  { %v615_v62 = vpop.xlane.xlu0 %614 }
 0xb12   :  { %2452 = vrcp.f32 %v615_v62  ;;  %v1729_v62 = vld [vmem:[%s2998_s12 + $0x10] sm:$0xff] }
 0xb15   :  { %v618_v10 = vpop.xlane.xlu0 %617 }
 0xb16   :  { %2454 = vrcp.f32 %v618_v10  ;;  %v1730_v10 = vld [vmem:[%s2998_s12 + $0x18] sm:$0xff] }
 0xb18   :  { %v2449_v8 = vpop.eup %2448 }
 0xb19   :  { %v2451_v47 = vpop.eup %2450  ;;  %v1441_v48 = vpop.permute.xlu0 %1440 }
 0xb1c   :  { %v2453_v55 = vpop.eup %2452 }
 0xb1d   :  { %v1449_v52 = vpop.permute.xlu0 %1448  ;;  %v621_v13 = vmul.f32 %v2453_v55, %v2735_v35  ;;  %v2307_v55 = vpack.c.bf16 %v1730_v10, %v1729_v62 }
 0xb1f   :  { %v1470_v15 = vsel %vm428_vm4, %v621_v13, %v1441_v48 }
 0xb20   :  { %v2455_v11 = vpop.eup %2454  ;;  %v1473_v19 = vsel %vm1472_vm7, %v1470_v15, %v1449_v52 }
 0xb21   :  { %v1451_v12 = vpop.permute.xlu0 %1450  ;;  %v622_v14 = vmul.f32 %v2455_v11, %v2733_v34  ;;  %v1476_v22 = vsel %vm1475_vm8, %v1473_v19, %v1457_v18  ;;  %v1929_v34 = vld [vmem:[%s2993_s7] ss:$0 sm:$0xff]  ;;  %v1737_v19 = vld [vmem:[%s2998_s12 + $0x50] sm:$0xff] }
 0xb22   :  { %v1731_v11 = vld [vmem:[%s2998_s12 + $0x20] sm:$0xff] }
 0xb23   :  { %v1471_v16 = vsel %vm428_vm4, %v622_v14, %v1443_v57  ;;  %v1733_v14 = vld [vmem:[%s2998_s12 + $0x30] sm:$0xff]  ;;  %v1734_v57 = vld [vmem:[%s2998_s12 + $0x38] sm:$0xff] }
 0xb24   :  { %v1474_v20 = vsel %vm1472_vm7, %v1471_v16, %v1451_v12  ;;  %v1732_v12 = vld [vmem:[%s2998_s12 + $0x28] sm:$0xff]  ;;  %v2315_v15 = vpack.c.bf16 %v1734_v57, %v1733_v14  ;;  %v1735_v16 = vld [vmem:[%s2998_s12 + $0x40] sm:$0xff] }
 0xb25   :  { %v1459_v17 = vpop.permute.xlu0 %1458  ;;  %v2311_v13 = vpack.c.bf16 %v1732_v12, %v1731_v11 }
 0xb26   :  { %v1477_v24 = vsel %vm1475_vm8, %v1474_v20, %v1459_v17  ;;  %v1736_v17 = vld [vmem:[%s2998_s12 + $0x48] sm:$0xff]  ;;  %v1738_v20 = vld [vmem:[%s2998_s12 + $0x58] sm:$0xff] }
 0xb27   :  { %v2319_v18 = vpack.c.bf16 %v1736_v17, %v1735_v16 }
 0xb4f   :  { %v2125_v9 = vpop.f32.mrb[16].mxu1 }
 0xb50   :  { %v1437_v54 = vmul.f32 %v2449_v8, %v2125_v9  ;;  %v1419_v60 = vpop.f32.mrb[17].mxu1 }
 0xb51   :  { %v1436_v56 = vmul.f32 %v2451_v47, %v1419_v60 }
 0xb52   :  { %1466 = vrot.lane.b32.xlu0 %v1437_v54, %s2506_s28  ;;  %v1934_v54 = vld [vmem:[%s2995_s9] ss:$0 sm:$0xff] }
 0xb53   :  { %1464 = vrot.lane.b32.xlu1 %v1436_v56, %s2506_s28 }
 0xbc4   :  { %v1467_v21 = vpop.permute.xlu0 %1466 }
 0xbc5   :  { %v1465_v23 = vpop.permute.xlu1 %1464  ;;  %v1480_v25 = vsel %vm1478_vm9, %v1477_v24, %v1467_v21  ;;  %v2323_v21 = vpack.c.bf16 %v1738_v20, %v1737_v19 }
 0xbc6   :  { %v1479_v35 = vsel %vm1478_vm9, %v1476_v22, %v1465_v23  ;;  %v1739_v22 = vld [vmem:[%s2998_s12 + $0x60] sm:$0xff]  ;;  %v1740_v23 = vld [vmem:[%s2998_s12 + $0x68] sm:$0xff] }
 0xbc7   :  { %2152 = vmatprep.mubr.msk.f32.mxu1 %vm1501_vm10, %v1479_v35  ;;  %v2327_v24 = vpack.c.bf16 %v1740_v23, %v1739_v22  ;;  %v1741_v35 = vld [vmem:[%s2998_s12 + $0x70] sm:$0xff] }
 0xbc8   :  { %2153 = vmatmul.mubr.msk.f32.vlgmr.msra.gmra.mrb[18].mxu1 %vm1501_vm10, %v1480_v25  ;;  %v1742_v25 = vld [vmem:[%s2998_s12 + $0x78] sm:$0xff] }
 0xc9b   :  { %v2154_v26 = vpop.f32.mrb[18].mxu1 }
 0xc9c   :  { %v1583_v28 = vadd.f32 %v2154_v26, %v1929_v34  ;;  %v1577_v1 = vpop.f32.mrb[19].mxu1  ;;  %v1935_v26 = vld [vmem:[%s2997_s11] ss:$0 sm:$0xff] }
 0xc9d   :  { %v1578_v36 = vadd.f32 %v1929_v34, %v1577_v1  ;;  %v2331_v34 = vpack.c.bf16 %v1742_v25, %v1741_v35 }
 0xc9e   :  { %v1587_v37 = vadd.f32 %v1583_v28, %v2656_v31 }
 0xc9f   :  { %v1586_v38 = vadd.f32 %v1578_v36, %v2652_v29  ;;  %v1633_v29 = vld [vmem:[%s2996_s10] sm:$0xff] }
 0xca0   :  { %v1593_v40 = vsel %vm263_vm3, %v1587_v37, 0.0  ;;  %v2295_v50 = vpack.c.bf16 %v1634_v49, %v1633_v29 }
 0xca1   :  { %1594 = vadd.xlane.f32.xlu0 %v1593_v40  ;;  %v1590_v27 = vsel %vm263_vm3, %v1586_v38, 0.0 }
 0xca2   :  { %1591 = vadd.xlane.f32.xlu1 %v1590_v27  ;;  %2296 = vmatprep.subr.bf16.mxu0 %v2295_v50  ;;  %v1938_v27 = vld [vmem:[%s2999_s13] ss:$0 sm:$0xff] }
 0xca3   :  { %2298 = vmatpush3.bf16.msra.mxu0 %v2295_v50 }
 0xca4   :  { %2300 = vmatprep.subr.bf16.mxu0 %v2299_v59 }
 0xca7   :  { %2302 = vmatpush3.bf16.msra.mxu0 %v2299_v59 }
 0xca8   :  { %2304 = vmatprep.subr.bf16.mxu0 %v2303_v44 }
 0xd2e   :  { %v1595_v41 = vpop.xlane.xlu0 %1594 }
 0xd2f   :  { %v1598_v30 = vmul.f32 0.03125, %v1595_v41  ;;  %v1592_v42 = vpop.xlane.xlu1 %1591 }
 0xd30   :  { %v1597_v43 = vmul.f32 0.03125, %v1592_v42 }
 0xd31   :  { %v1600_v2 = vsub.f32 %v1587_v37, %v1598_v30 }
 0xd32   :  { %v1599_v33 = vsub.f32 %v1586_v38, %v1597_v43 }
 0xd33   :  { %v1602_v45 = vmul.f32 %v1600_v2, %v1600_v2 }
 0xd34   :  { %v1601_v46 = vmul.f32 %v1599_v33, %v1599_v33 }
 0xd35   :  { %v1606_v32 = vsel %vm263_vm3, %v1602_v45, 0.0 }
 0xd36   :  { %1607 = vadd.xlane.f32.xlu1 %v1606_v32  ;;  %v1603_v31 = vsel %vm263_vm3, %v1601_v46, 0.0 }
 0xd37   :  { %1604 = vadd.xlane.f32.xlu0 %v1603_v31 }
 0xdc3   :  { %v1608_v51 = vpop.xlane.xlu1 %1607 }
 0xdc4   :  { %v1610_v0 = vmul.f32 0.03125, %v1608_v51  ;;  %v1605_v3 = vpop.xlane.xlu0 %1604 }
 0xdc5   :  { %v1609_v4 = vmul.f32 0.03125, %v1605_v3 }
 0xdc6   :  { %v1612_v5 = vadd.f32 1e-05, %v1610_v0 }
 0xdc7   :  { %v1611_v6 = vadd.f32 1e-05, %v1609_v4 }
 0xdc8   :  { %2456 = vrsqrt.f32 %v1612_v5 }
 0xdc9   :  { %2458 = vrsqrt.f32 %v1611_v6 }
 0xdd2   :  { %v2457_v7 = vpop.eup %2456 }
 0xdd3   :  { %v2459_v8 = vpop.eup %2458  ;;  %v1616_v9 = vmul.f32 %v2457_v7, %v1600_v2  ;;  %v1939_v7 = vld [vmem:[%s3000_s14] ss:$0 sm:$0xff] }
 0xdd4   :  { %v1615_v47 = vmul.f32 %v2459_v8, %v1599_v33 }
 0xdd5   :  { %v1624_v60 = vmul.f32 %v1933_v61, %v1616_v9 }
 0xdd6   :  { %v1623_v56 = vmul.f32 %v1933_v61, %v1615_v47  ;;  %v1940_v47 = vld [vmem:[%s3001_s15] ss:$0 sm:$0xff] }
 0xdd7   :  { %v1632_v52 = vadd.f32 %v1934_v54, %v1624_v60 }
 0xdd8   :  { %v1631_v48 = vadd.f32 %v1934_v54, %v1623_v56 }
 0xdda   :  { %2163 = vmatprep.mubr.msk.f32.mxu0 %vm263_vm3, %v1631_v48 }
 0xddb   :  { %2164 = vmatmul.mubr.msk.f32.vlgmr.msra.gmra.mrb[12].mxu0 %vm263_vm3, %v1632_v52 }
 0xddc   :  { %2306 = vmatpush3.bf16.msra.mxu0 %v2303_v44 }
 0xddd   :  { %2308 = vmatprep.subr.bf16.mxu0 %v2307_v55 }
 0xde0   :  { %2310 = vmatpush3.bf16.msra.mxu0 %v2307_v55 }
 0xde1   :  { %2312 = vmatprep.subr.bf16.mxu0 %v2311_v13 }
 0xde4   :  { %2314 = vmatpush3.bf16.msra.mxu0 %v2311_v13 }
 0xde5   :  { %2316 = vmatprep.subr.bf16.mxu0 %v2315_v15 }
 0xde8   :  { %2318 = vmatpush3.bf16.msra.mxu0 %v2315_v15 }
 0xde9   :  { %2320 = vmatprep.subr.bf16.mxu0 %v2319_v18 }
 0xdec   :  { %2322 = vmatpush3.bf16.msra.mxu0 %v2319_v18 }
 0xded   :  { %2324 = vmatprep.subr.bf16.mxu0 %v2323_v21 }
 0xdf0   :  { %2326 = vmatpush3.bf16.msra.mxu0 %v2323_v21 }
 0xdf1   :  { %2328 = vmatprep.subr.bf16.mxu0 %v2327_v24 }
 0xdf4   :  { %2330 = vmatpush3.bf16.msra.mxu0 %v2327_v24 }
 0xdf5   :  { %2332 = vmatprep.subr.bf16.mxu0 %v2331_v34 }
 0xdf8   :  { %2334 = vmatpush3.bf16.msra.mxu0 %v2331_v34 }
 0xeae   :  { %v2165_v28 = vpop.f32.mrb[12].mxu0 }
 0xeaf   :  { %v1722_v1 = vadd.f32 %v2165_v28, %v1935_v26  ;;  %v1716_v36 = vpop.f32.mrb[13].mxu0 }
 0xeb0   :  { %v1717_v37 = vadd.f32 %v1935_v26, %v1716_v36 }
 0xeb1   :  { %v1726_v40 = vmax.f32 %v1722_v1, 0.0 }
 0xeb2   :  { %v1725_v38 = vmax.f32 %v1717_v37, 0.0 }
 0xeb4   :  { %2198 = vmatprep.mubr.f32.mxu0 %v1725_v38 }
 0xeb5   :  { %2199 = vmatmul.mubr.f32.vlgmr.msra.gmra.mrb[14].mxu0 %v1726_v40 }
 0xf88   :  { %v2200_v41 = vpop.f32.mrb[14].mxu0 }
 0xf89   :  { %v1822_v30 = vadd.f32 %v2200_v41, %v1938_v27  ;;  %v1816_v42 = vpop.f32.mrb[15].mxu0 }
 0xf8a   :  { %v1817_v43 = vadd.f32 %v1938_v27, %v1816_v42 }
 0xf8b   :  { %v1826_v2 = vadd.f32 %v1822_v30, %v1632_v52 }
 0xf8c   :  { %v1825_v33 = vadd.f32 %v1817_v43, %v1631_v48 }
 0xf8d   :  { %v1832_v45 = vsel %vm263_vm3, %v1826_v2, 0.0 }
 0xf8e   :  { %1833 = vadd.xlane.f32.xlu1 %v1832_v45  ;;  %v1829_v46 = vsel %vm263_vm3, %v1825_v33, 0.0 }
 0xf8f   :  { %1830 = vadd.xlane.f32.xlu0 %v1829_v46 }
0x101b   :  { %v1834_v32 = vpop.xlane.xlu1 %1833 }
0x101c   :  { %v1836_v31 = vmul.f32 0.03125, %v1834_v32  ;;  %v1831_v29 = vpop.xlane.xlu0 %1830 }
0x101d   :  { %v1835_v49 = vmul.f32 0.03125, %v1831_v29 }
0x101e   :  { %v1838_v50 = vsub.f32 %v1826_v2, %v1836_v31 }
0x101f   :  { %v1837_v53 = vsub.f32 %v1825_v33, %v1835_v49 }
0x1020   :  { %v1840_v58 = vmul.f32 %v1838_v50, %v1838_v50 }
0x1021   :  { %v1839_v59 = vmul.f32 %v1837_v53, %v1837_v53 }
0x1022   :  { %v1844_v39 = vsel %vm263_vm3, %v1840_v58, 0.0 }
0x1023   :  { %1845 = vadd.xlane.f32.xlu1 %v1844_v39  ;;  %v1841_v63 = vsel %vm263_vm3, %v1839_v59, 0.0 }
0x1024   :  { %1842 = vadd.xlane.f32.xlu0 %v1841_v63 }
0x10b0   :  { %v1846_v44 = vpop.xlane.xlu1 %1845 }
0x10b1   :  { %v1848_v51 = vmul.f32 0.03125, %v1846_v44  ;;  %v1843_v0 = vpop.xlane.xlu0 %1842 }
0x10b2   :  { %v1847_v3 = vmul.f32 0.03125, %v1843_v0 }
0x10b3   :  { %v1850_v4 = vadd.f32 1e-05, %v1848_v51 }
0x10b4   :  { %v1849_v5 = vadd.f32 1e-05, %v1847_v3 }
0x10b5   :  { %2460 = vrsqrt.f32 %v1850_v4 }
0x10b6   :  { %2462 = vrsqrt.f32 %v1849_v5 }
0x10bf   :  { %v2461_v6 = vpop.eup %2460 }
0x10c0   :  { %v2463_v61 = vpop.eup %2462  ;;  %v1854_v8 = vmul.f32 %v2461_v6, %v1838_v50 }
0x10c1   :  { %v1853_v9 = vmul.f32 %v2463_v61, %v1837_v53 }
0x10c2   :  { %v1862_v54 = vmul.f32 %v1939_v7, %v1854_v8 }
0x10c3   :  { %v1861_v60 = vmul.f32 %v1939_v7, %v1853_v9 }
0x10c4   :  { %v1870_v56 = vadd.f32 %v1940_v47, %v1862_v54 }
0x10c5   :  { %v1869_v62 = vadd.f32 %v1940_v47, %v1861_v60 }
0x10c6   :  { %1872 = vst.msk [vmem:[#allocation2 + $0x8] sm:$0xff] %vm263_vm3, %v1870_v56 }
0x10c7   :  { %1871 = vst.msk [vmem:[#allocation2] sm:$0xff] %vm263_vm3, %v1869_v62 }
0x10c8   :  { %2475 = shalt.err (!%p2472_p4)
}
0x10c9   :  { %s2476_s1 = scalar_lea.hbm %s3002_s16, 256 }
0x10ca   :  { %p2477_p5 = scmp.ne.s32.totalorder %s3002_s16, %s2476_s1  ;;  %p2480_p6 = scmp.lt.u32.totalorder %s2476_s1, %s3002_s16 }
0x10cc   :  { %p2482_p7 = pnand %p2480_p6, %p2477_p5 }
0x10ce   :  { %2485 = shalt.err (!%p2482_p7)
}
0x10cf   :  { %s2508_s21 = smov 128  }
0x10d0   :  { %1884 = dma.vmem_to_hbm [thread:$0]  %s1879_s30, 256, %s3002_s16, [#allocation3], %s2508_s21, %s2508_s21, %s2491_s25  }
0x10d1   :  { %2486 = dma.done.wait [#allocation3], 256  }
0x10d2   :  { %2487 = vsyncadd [#allocation3], 4294967040 }
0x10d3   :  { %1888 = vsyncpa [#allocation3], 1 }

</bundles_post_ra>
